<compile_context>
chip_gen: v7x
topology: tpu7x:2x2x1
jax: 0.10.0
libtpu: 0.0.40
codegen_flags: <defaults>
</compile_context>

<pallas_src>
import jax
import jax.numpy as jnp
from jax import lax
from jax.experimental import pallas as pl
from jax.experimental.pallas import tpu as pltpu


def _make_kernel(activation_dtype):
    def _mlp_kernel(x_ref, w1T_ref, b1_ref, w2T_ref, b2_ref, w3_ref, b3_ref, o_ref):
        # obs tile in natural (TB, obs_dim) layout; cast in-kernel (hidden under DMA).
        x = x_ref[...].astype(w1T_ref.dtype)
        # Layer 1: contract obs_dim of both operands -> (h1, TB); batch -> lanes.
        h = lax.dot_general(w1T_ref[...], x, (((1,), (1,)), ((), ())),
                            preferred_element_type=jnp.float32)
        h = jnp.tanh((h + b1_ref[...]).astype(activation_dtype))
        # Layer 2: (h2, h1) @ (h1, TB) -> (h2, TB); f32 accumulation.
        h = jnp.dot(w2T_ref[...], h.astype(w2T_ref.dtype),
                    preferred_element_type=jnp.float32)
        h = jnp.tanh((h + b2_ref[...]).astype(activation_dtype))
        # Output layer (out_features = 1): VPU multiply + XLU sublane reduce;
        # result is a lane-dense (1, TB) value row (unmasked full-width store).
        v = jnp.sum(h.astype(jnp.float32) * w3_ref[...], axis=0, keepdims=True)
        o_ref[...] = (v + b3_ref[...]).astype(o_ref.dtype)
    return _mlp_kernel


def _round_up(x, m):
    return ((x + m - 1) // m) * m


def state_value_function(obs, params, *, block_b=4096, matmul_dtype=None,
                         activation_dtype=jnp.float32, vmem_limit_bytes=None):
    """Pallas-backed forward pass of StateValueFunction.

    obs:    (B, obs_dim) float32, natural layout (no wrapper transpose/pad).
    params: dict with w1 (obs_dim,h1), b1 (1,h1), w2 (h1,h2), b2 (1,h2),
            w3 (h2,1), b3 (1,1)  (torch Linear weights pre-transposed to (in,out)).
    returns (B, 1) float32.

    block_b:          batch rows per grid step (multiple of 128). 4096 default;
                      8192-16384 on v7x (raise vmem_limit_bytes accordingly).
    matmul_dtype:     optional MXU operand dtype (e.g. jnp.bfloat16 on v6e/v7x);
                      obs is cast in-kernel, accumulation stays f32.
    activation_dtype: dtype for the tanh evaluations (bf16 doubles EUP rate on
                      v6e/v7x; keep f32 on v5e and for tight tolerances).
    """
    B, obs_dim = obs.shape
    block_b = max(128, (int(block_b) // 128) * 128)
    TB = min(block_b, B)
    num_tiles = pl.cdiv(B, TB)
    # Give both v7x TensorCores work on the "parallel" axis when B is large.
    if num_tiles == 1 and B >= 256:
        TB = _round_up(pl.cdiv(B, 2), 128)
        num_tiles = pl.cdiv(B, TB)

    # Tiny resident operands: layout plumbing (and optional cast) is cheap here.
    w1t = params["w1"].T                     # (h1, obs_dim)
    w2t = params["w2"].T                     # (h2, h1)
    b1c = params["b1"].reshape(-1, 1)        # (h1, 1)
    b2c = params["b2"].reshape(-1, 1)        # (h2, 1)
    w3c = params["w3"].reshape(-1, 1)        # (h2, 1)
    b3c = params["b3"].reshape(1, 1)         # (1, 1)
    if matmul_dtype is not None:
        w1t = w1t.astype(matmul_dtype)
        w2t = w2t.astype(matmul_dtype)

    resident = pl.BlockSpec(memory_space=pltpu.MemorySpace.VMEM)  # loaded once
    cp_kwargs = dict(dimension_semantics=("parallel",))
    if vmem_limit_bytes is not None:
        cp_kwargs["vmem_limit_bytes"] = int(vmem_limit_bytes)

    out = pl.pallas_call(
        _make_kernel(activation_dtype),
        out_shape=jax.ShapeDtypeStruct((1, B), jnp.float32),
        grid=(num_tiles,),
        in_specs=[
            pl.BlockSpec((TB, obs_dim), lambda i: (i, 0)),  # obs tile, double-buffered
            resident, resident, resident, resident, resident, resident,
        ],
        out_specs=pl.BlockSpec((1, TB), lambda i: (0, i)),  # lane-dense value row
        compiler_params=pltpu.CompilerParams(**cp_kwargs),
    )(obs, w1t, b1c, w2t, b2c, w3c, b3c)
    return out.reshape(B, 1)


def init_params(key, obs_dim, hidden_sizes):
    """Deterministic synthetic parameter init (shapes match the torch module)."""
    sizes = [obs_dim, *hidden_sizes, 1]
    params = {}
    for i in range(len(sizes) - 1):
        key, kw, kb = jax.random.split(key, 3)
        fan_in = sizes[i]
        scale = 1.0 / jnp.sqrt(jnp.float32(fan_in))
        params[f"w{i+1}"] = (jax.random.uniform(
            kw, (sizes[i], sizes[i + 1]), jnp.float32, -1.0, 1.0) * scale)
        params[f"b{i+1}"] = (jax.random.uniform(
            kb, (1, sizes[i + 1]), jnp.float32, -1.0, 1.0) * scale)
    return params


def _reference(obs, params):
    h = jnp.tanh(obs @ params["w1"] + params["b1"])
    h = jnp.tanh(h @ params["w2"] + params["b2"])
    return h @ params["w3"] + params["b3"]


if __name__ == "__main__":
    obs_dim = 32
    hidden_sizes = [64, 64]   # activation = tanh (nn.Tanh)

    key = jax.random.PRNGKey(0)
    key, k_obs1, k_obs2 = jax.random.split(key, 3)
    params = init_params(key, obs_dim, hidden_sizes)

    # Case 1: tiny batch (single full block).
    obs_small = jax.random.normal(k_obs1, (8, obs_dim), jnp.float32)
    out_small = jax.block_until_ready(state_value_function(obs_small, params))
    ref_small = _reference(obs_small, params)
    assert out_small.shape == (8, 1), out_small.shape
    assert jnp.allclose(out_small, ref_small, atol=1e-5, rtol=1e-5)

    # Case 2: batch not tile-aligned (ragged last block, 2 tiles -> megacore path).
    obs_ragged = jax.random.normal(k_obs2, (300, obs_dim), jnp.float32)
    out_ragged = jax.block_until_ready(state_value_function(obs_ragged, params))
    ref_ragged = _reference(obs_ragged, params)
    assert out_ragged.shape == (300, 1), out_ragged.shape
    assert jnp.allclose(out_ragged, ref_ragged, atol=1e-5, rtol=1e-5)

    print("KERNEL_OK")
</pallas_src>

<mosaic_0001>
module attributes {stable_mosaic.version = 11 : i64} {
  func.func @_mlp_kernel(%arg0: i32, %arg1: memref<8x32xf32, #tpu.memory_space<vmem>>, %arg2: memref<64x32xf32, #tpu.memory_space<vmem>>, %arg3: memref<64x1xf32, #tpu.memory_space<vmem>>, %arg4: memref<64x64xf32, #tpu.memory_space<vmem>>, %arg5: memref<64x1xf32, #tpu.memory_space<vmem>>, %arg6: memref<64x1xf32, #tpu.memory_space<vmem>>, %arg7: memref<1x1xf32, #tpu.memory_space<vmem>>, %arg8: memref<1x8xf32, #tpu.memory_space<vmem>>) attributes {dimension_semantics = [#tpu.dimension_semantics<parallel>], iteration_bounds = array<i64: 1>, scalar_prefetch = 0 : i64, scratch_operands = 0 : i64, tpu.core_type = #tpu.core_type<tc>, window_params = [{transform_indices = @transform_0, window_bounds = array<i64: 8, 32>}, {pipeline_mode = #tpu.pipeline_mode<synchronous>, transform_indices = @transform_1, window_bounds = array<i64: 64, 32>}, {pipeline_mode = #tpu.pipeline_mode<synchronous>, transform_indices = @transform_2, window_bounds = array<i64: 64, 1>}, {pipeline_mode = #tpu.pipeline_mode<synchronous>, transform_indices = @transform_3, window_bounds = array<i64: 64, 64>}, {pipeline_mode = #tpu.pipeline_mode<synchronous>, transform_indices = @transform_4, window_bounds = array<i64: 64, 1>}, {pipeline_mode = #tpu.pipeline_mode<synchronous>, transform_indices = @transform_5, window_bounds = array<i64: 64, 1>}, {pipeline_mode = #tpu.pipeline_mode<synchronous>, transform_indices = @transform_6, window_bounds = array<i64: 1, 1>}, {transform_indices = @transform_7, window_bounds = array<i64: 1, 8>}]} {
    %c0 = arith.constant 0 : index
    %c0_0 = arith.constant 0 : index
    %0 = vector.load %arg1[%c0, %c0_0] : memref<8x32xf32, #tpu.memory_space<vmem>>, vector<8x32xf32>
    %c0_1 = arith.constant 0 : index
    %c0_2 = arith.constant 0 : index
    %1 = vector.load %arg2[%c0_1, %c0_2] : memref<64x32xf32, #tpu.memory_space<vmem>>, vector<64x32xf32>
    %cst = arith.constant dense<0.000000e+00> : vector<64x8xf32>
    %2 = tpu.matmul %1, %0, %cst {dimension_numbers = #tpu.dot_dimension_numbers<[1], [1], [0], [0], [0, 0, 1, 0], [], []>} : vector<64x32xf32>, vector<8x32xf32>, vector<64x8xf32> -> vector<64x8xf32>
    %c0_3 = arith.constant 0 : index
    %c0_4 = arith.constant 0 : index
    %3 = vector.load %arg3[%c0_3, %c0_4] : memref<64x1xf32, #tpu.memory_space<vmem>>, vector<64x1xf32>
    %4 = vector.broadcast %3 : vector<64x1xf32> to vector<64x8xf32>
    %5 = arith.addf %2, %4 : vector<64x8xf32>
    %6 = math.tanh %5 : vector<64x8xf32>
    %c0_5 = arith.constant 0 : index
    %c0_6 = arith.constant 0 : index
    %7 = vector.load %arg4[%c0_5, %c0_6] : memref<64x64xf32, #tpu.memory_space<vmem>>, vector<64x64xf32>
    %cst_7 = arith.constant dense<0.000000e+00> : vector<64x8xf32>
    %8 = tpu.matmul %7, %6, %cst_7 {dimension_numbers = #tpu.dot_dimension_numbers<[1], [0], [0], [1], [0, 0, 1, 1], [], []>} : vector<64x64xf32>, vector<64x8xf32>, vector<64x8xf32> -> vector<64x8xf32>
    %c0_8 = arith.constant 0 : index
    %c0_9 = arith.constant 0 : index
    %9 = vector.load %arg5[%c0_8, %c0_9] : memref<64x1xf32, #tpu.memory_space<vmem>>, vector<64x1xf32>
    %10 = vector.broadcast %9 : vector<64x1xf32> to vector<64x8xf32>
    %11 = arith.addf %8, %10 : vector<64x8xf32>
    %12 = math.tanh %11 : vector<64x8xf32>
    %c0_10 = arith.constant 0 : index
    %c0_11 = arith.constant 0 : index
    %13 = vector.load %arg6[%c0_10, %c0_11] : memref<64x1xf32, #tpu.memory_space<vmem>>, vector<64x1xf32>
    %14 = vector.broadcast %13 : vector<64x1xf32> to vector<64x8xf32>
    %15 = arith.mulf %12, %14 : vector<64x8xf32>
    %cst_12 = arith.constant dense<0.000000e+00> : vector<8xf32>
    %16 = vector.multi_reduction <add>, %15, %cst_12 [0] : vector<64x8xf32> to vector<8xf32>
    %17 = vector.shape_cast %16 : vector<8xf32> to vector<1x8xf32>
    %c0_13 = arith.constant 0 : index
    %c0_14 = arith.constant 0 : index
    %18 = vector.load %arg7[%c0_13, %c0_14] : memref<1x1xf32, #tpu.memory_space<vmem>>, vector<1x1xf32>
    %19 = vector.broadcast %18 : vector<1x1xf32> to vector<1x8xf32>
    %20 = arith.addf %17, %19 : vector<1x8xf32>
    %c0_15 = arith.constant 0 : index
    %c0_16 = arith.constant 0 : index
    %21 = vector.load %arg8[%c0_15, %c0_16] : memref<1x8xf32, #tpu.memory_space<vmem>>, vector<1x8xf32>
    tpu.vector_store %arg8[%c0_15, %c0_16], %20 {strides = array<i32>} : memref<1x8xf32, #tpu.memory_space<vmem>>, vector<1x8xf32>,
    return
  }
  func.func @transform_0(%arg0: i32) -> (i32, i32) {
    %c0_i32 = arith.constant 0 : i32
    %c0_i32_0 = arith.constant 0 : i32
    return %arg0, %c0_i32 : i32, i32
  }
  func.func @transform_1(%arg0: i32) -> (i32, i32) {
    %c0_i32 = arith.constant 0 : i32
    %c0_i32_0 = arith.constant 0 : i32
    %c0_i32_1 = arith.constant 0 : i32
    return %c0_i32, %c0_i32_0 : i32, i32
  }
  func.func @transform_2(%arg0: i32) -> (i32, i32) {
    %c0_i32 = arith.constant 0 : i32
    %c0_i32_0 = arith.constant 0 : i32
    %c0_i32_1 = arith.constant 0 : i32
    return %c0_i32, %c0_i32_0 : i32, i32
  }
  func.func @transform_3(%arg0: i32) -> (i32, i32) {
    %c0_i32 = arith.constant 0 : i32
    %c0_i32_0 = arith.constant 0 : i32
    %c0_i32_1 = arith.constant 0 : i32
    return %c0_i32, %c0_i32_0 : i32, i32
  }
  func.func @transform_4(%arg0: i32) -> (i32, i32) {
    %c0_i32 = arith.constant 0 : i32
    %c0_i32_0 = arith.constant 0 : i32
    %c0_i32_1 = arith.constant 0 : i32
    return %c0_i32, %c0_i32_0 : i32, i32
  }
  func.func @transform_5(%arg0: i32) -> (i32, i32) {
    %c0_i32 = arith.constant 0 : i32
    %c0_i32_0 = arith.constant 0 : i32
    %c0_i32_1 = arith.constant 0 : i32
    return %c0_i32, %c0_i32_0 : i32, i32
  }
  func.func @transform_6(%arg0: i32) -> (i32, i32) {
    %c0_i32 = arith.constant 0 : i32
    %c0_i32_0 = arith.constant 0 : i32
    %c0_i32_1 = arith.constant 0 : i32
    return %c0_i32, %c0_i32_0 : i32, i32
  }
  func.func @transform_7(%arg0: i32) -> (i32, i32) {
    %c0_i32 = arith.constant 0 : i32
    %c0_i32_0 = arith.constant 0 : i32
    return %c0_i32, %arg0 : i32, i32
  }
}

</mosaic_0001>

<bundles_post_ra>
// kernel: tpu_custom_call.1
= control target key start
LH: loop header
LB: loop body
LE: loop exit
PB: predicated region body
PF: predicated region fallthrough
CT: control target
= control target key end

     0   :  { %s900_s0 = inlined_call_operand.vmem [shape: f32[8,32], index: 0, kind: input, shape index: {}]   ;;  %s901_s1 = inlined_call_operand.vmem [shape: f32[64,32], index: 1, kind: input, shape index: {}]   ;;  %s902_s2 = inlined_call_operand.vmem [shape: f32[64,1], index: 2, kind: input, shape index: {}]   ;;  %s903_s3 = inlined_call_operand.vmem [shape: f32[64,64], index: 3, kind: input, shape index: {}]   ;;  %s904_s4 = inlined_call_operand.vmem [shape: f32[64,1], index: 4, kind: input, shape index: {}]   ;;  %s905_s5 = inlined_call_operand.vmem [shape: f32[64,1], index: 5, kind: input, shape index: {}]   ;;  %s906_s6 = inlined_call_operand.<no memory space> [shape: f32[1,1], index: 6, kind: input, shape index: {}]   ;;  %s907_s7 = inlined_call_operand.hbm [shape: f32[1,8], index: 7, kind: output, shape index: {}]  }
   0x1   :  { %v12_v0 = vstv %s906_s6 }
   0x2   :  { %13 = vst [vmem:[#allocation2] sm:$0x1] %v12_v0 }
   0x3   :  { %v29_v1 = vld [vmem:[%s900_s0] sm:$0xff]  ;;  %vm86_vm0 = vcmask 261120   ;;  %v31_v3 = vld [vmem:[%s901_s1 + $0x8] sm:$0xff]  ;;  %v694_v4 = vmov 0   ;;  %v32_v5 = vld [vmem:[%s901_s1 + $0x10] sm:$0xff] }
   0x4   :  { %v30_v2 = vld [vmem:[%s901_s1] sm:$0xff]  ;;  %568 = vmatprep.subr.msk.mxu0 %vm86_vm0, %v29_v1  ;;  %636 = vset.pattern.permute.xlu0 %v694_v4  ;;  %v40_v7 = vld [vmem:[%s902_s2 + $0x10] sm:$0xff]  ;;  %v39_v8 = vld [vmem:[%s902_s2 + $0x8] sm:$0xff] }
   0x5   :  { %570 = vmatprep.mubr.msk.f32.mxu0 %vm86_vm0, %v30_v2  ;;  %569 = vmatpush3.xpose.msk.msra.mxu0 %vm86_vm0, %v29_v1  ;;  %v38_v6 = vld [vmem:[%s902_s2] sm:$0xff]  ;;  %v41_v9 = vld [vmem:[%s902_s2 + $0x18] sm:$0xff]  ;;  %v43_v13 = vld [vmem:[%s902_s2 + $0x28] sm:$0xff] }
   0x6   :  { %637 = vset.pattern.permute.xlu1 %v694_v4  ;;  %48 = vperm.xlu0 %636, %v38_v6   ;;  %v33_v10 = vld [vmem:[%s901_s1 + $0x18] sm:$0xff]  ;;  %v34_v11 = vld [vmem:[%s901_s1 + $0x20] sm:$0xff]  ;;  %v35_v14 = vld [vmem:[%s901_s1 + $0x28] sm:$0xff] }
   0x7   :  { %58 = vperm.xlu1 %637, %v40_v7   ;;  %v42_v12 = vld [vmem:[%s902_s2 + $0x20] sm:$0xff]  ;;  %v36_v15 = vld [vmem:[%s901_s1 + $0x30] sm:$0xff] }
   0x8   :  { %571 = vmatmul.mubr.msk.f32.vlgmr.msra.gmra.mrb[0].mxu0 %vm86_vm0, %v31_v3 }
   0x9   :  { %573 = vmatprep.mubr.msk.f32.mxu0 %vm86_vm0, %v32_v5 }
   0xa   :  { %53 = vperm.xlu0 %636, %v39_v8  }
   0xb   :  { %63 = vperm.xlu1 %637, %v41_v9  }
   0xc   :  { %574 = vmatmul.mubr.msk.f32.gmra.mrb[2].mxu0 %vm86_vm0, %v33_v10 }
   0xd   :  { %576 = vmatprep.mubr.msk.f32.mxu0 %vm86_vm0, %v34_v11 }
   0xe   :  { %14 = vsyncpa [#allocation4], 0  ;;  %68 = vperm.xlu0 %636, %v42_v12   ;;  %v44_v16 = vld [vmem:[%s902_s2 + $0x30] sm:$0xff]  ;;  %v45_v17 = vld [vmem:[%s902_s2 + $0x38] sm:$0xff]  ;;  %vm283_vm1 = vcmask 523264   ;;  %vm477_vm2 = vcmask 64512  }
   0xf   :  { %73 = vperm.xlu1 %637, %v43_v13   ;;  %v37_v18 = vld [vmem:[%s901_s1 + $0x38] sm:$0xff]  ;;  %v235_v19 = vld [vmem:[%s904_s4] sm:$0xff]  ;;  %v236_v20 = vld [vmem:[%s904_s4 + $0x8] sm:$0xff]  ;;  %vm510_vm3 = vcmask 57344  }
  0x10   :  { %577 = vmatmul.mubr.msk.f32.gmra.mrb[4].mxu0 %vm86_vm0, %v35_v14  ;;  %v237_v21 = vld [vmem:[%s904_s4 + $0x10] sm:$0xff]  ;;  %v238_v22 = vld [vmem:[%s904_s4 + $0x18] sm:$0xff]  ;;  %v239_v23 = vld [vmem:[%s904_s4 + $0x20] sm:$0xff] }
  0x11   :  { %579 = vmatprep.mubr.msk.f32.mxu0 %vm86_vm0, %v36_v15  ;;  %v240_v24 = vld [vmem:[%s904_s4 + $0x28] sm:$0xff]  ;;  %v241_v25 = vld [vmem:[%s904_s4 + $0x30] sm:$0xff]  ;;  %v242_v26 = vld [vmem:[%s904_s4 + $0x38] sm:$0xff] }
  0x12   :  { %78 = vperm.xlu0 %636, %v44_v16   ;;  %v421_v27 = vld [vmem:[%s905_s5] sm:$0xff]  ;;  %v422_v28 = vld [vmem:[%s905_s5 + $0x8] sm:$0xff]  ;;  %v423_v29 = vld [vmem:[%s905_s5 + $0x10] sm:$0xff] }
  0x13   :  { %83 = vperm.xlu1 %637, %v45_v17   ;;  %v424_v30 = vld [vmem:[%s905_s5 + $0x18] sm:$0xff]  ;;  %v425_v31 = vld [vmem:[%s905_s5 + $0x20] sm:$0xff]  ;;  %v426_v32 = vld [vmem:[%s905_s5 + $0x28] sm:$0xff] }
  0x14   :  { %580 = vmatmul.mubr.msk.f32.gmra.mrb[6].mxu0 %vm86_vm0, %v37_v18  ;;  %v427_v33 = vld [vmem:[%s905_s5 + $0x30] sm:$0xff]  ;;  %v428_v34 = vld [vmem:[%s905_s5 + $0x38] sm:$0xff]  ;;  %v499_v35 = vld [vmem:[#allocation2] sm:$0x1] }
  0x15   :  { %v227_v36 = vld [vmem:[%s903_s3] sm:$0xff]  ;;  %v229_v37 = vld [vmem:[%s903_s3 + $0x10] sm:$0xff]  ;;  %v228_v10 = vld [vmem:[%s903_s3 + $0x8] sm:$0xff] }
  0x16   :  { %245 = vperm.xlu0 %636, %v235_v19   ;;  %598 = vmatprep.mubr.msk.f32.mxu0 %vm283_vm1, %v227_v36  ;;  %v230_v11 = vld [vmem:[%s903_s3 + $0x18] sm:$0xff]  ;;  %v231_v12 = vld [vmem:[%s903_s3 + $0x20] sm:$0xff]  ;;  %v232_v13 = vld [vmem:[%s903_s3 + $0x28] sm:$0xff] }
  0x17   :  { %250 = vperm.xlu1 %637, %v236_v20   ;;  %601 = vmatprep.mubr.msk.f32.mxu1 %vm283_vm1, %v229_v37  ;;  %v233_v14 = vld [vmem:[%s903_s3 + $0x30] sm:$0xff]  ;;  %v234_v15 = vld [vmem:[%s903_s3 + $0x38] sm:$0xff]  ;;  %s695_s3 = smov [#allocation3]  }
  0x18   :  { %s518_s27 = sshll.u32 %s695_s3, 4  ;;  %s519_s27 = int_to_ptr.vmem [resolvable:$true] %s518_s27 }
  0x19   :  { %s670_s28 = scalar_lea.vmem %s519_s27, 16  ;;  %s674_s29 = scalar_lea.vmem %s519_s27, 32 }
  0x1a   :  { %255 = vperm.xlu0 %636, %v237_v21   ;;  %p671_p0 = scmp.ne.s32.totalorder %s519_s27, %s670_s28  ;;  %p675_p1 = scmp.lt.s32.totalorder %s519_s27, %s519_s27 }
  0x1b   :  { %260 = vperm.xlu1 %637, %v238_v22   ;;  %p676_p2 = scmp.lt.s32.totalorder %s674_s29, %s670_s28 }
  0x1d   :  { %p677_p3 = por %p676_p2, %p675_p1 }
  0x1e   :  { %265 = vperm.xlu0 %636, %v239_v23  }
  0x1f   :  { %270 = vperm.xlu1 %637, %v240_v24   ;;  %p678_p4 = pnand %p677_p3, %p671_p0 }
  0x22   :  { %275 = vperm.xlu0 %636, %v241_v25  }
  0x23   :  { %280 = vperm.xlu1 %637, %v242_v26  }
  0x26   :  { %431 = vperm.xlu0 %636, %v421_v27  }
  0x27   :  { %436 = vperm.xlu1 %637, %v422_v28  }
  0x2a   :  { %441 = vperm.xlu0 %636, %v423_v29  }
  0x2b   :  { %446 = vperm.xlu1 %637, %v424_v30  }
  0x2e   :  { %451 = vperm.xlu0 %636, %v425_v31  }
  0x2f   :  { %456 = vperm.xlu1 %637, %v426_v32  }
  0x32   :  { %461 = vperm.xlu0 %636, %v427_v33  }
  0x33   :  { %466 = vperm.xlu1 %637, %v428_v34  }
  0x36   :  { %502 = vperm.xlu0 %636, %v499_v35  }
  0x85   :  { %v49_v38 = vpop.permute.xlu0 %48 }
  0x86   :  { %v59_v39 = vpop.permute.xlu1 %58 }
  0x89   :  { %v54_v40 = vpop.permute.xlu0 %53 }
  0x8a   :  { %v64_v41 = vpop.permute.xlu1 %63 }
  0x8d   :  { %v69_v51 = vpop.permute.xlu0 %68 }
  0x8e   :  { %v74_v49 = vpop.permute.xlu1 %73 }
  0x91   :  { %v79_v59 = vpop.permute.xlu0 %78 }
  0x92   :  { %v84_v56 = vpop.permute.xlu1 %83 }
  0x95   :  { %v246_v16 = vpop.permute.xlu0 %245 }
  0x96   :  { %v251_v17 = vpop.permute.xlu1 %250 }
  0x99   :  { %v256_v18 = vpop.permute.xlu0 %255 }
  0x9a   :  { %v261_v19 = vpop.permute.xlu1 %260 }
  0x9d   :  { %v266_v20 = vpop.permute.xlu0 %265 }
  0x9e   :  { %v271_v21 = vpop.permute.xlu1 %270 }
  0xa1   :  { %v276_v22 = vpop.permute.xlu0 %275 }
  0xa2   :  { %v281_v23 = vpop.permute.xlu1 %280 }
  0xa5   :  { %v432_v33 = vpop.permute.xlu0 %431 }
  0xa6   :  { %v437_v37 = vpop.permute.xlu1 %436 }
  0xdb   :  { %v572_v42 = vpop.f32.mrb[0].mxu0 }
  0xdc   :  { %v186_v43 = vadd.f32 %v572_v42, %v54_v40  ;;  %v180_v44 = vpop.f32.mrb[1].mxu0  ;;  %v442_v42 = vpop.permute.xlu0 %441 }
  0xdd   :  { %v181_v45 = vadd.f32 %v180_v44, %v49_v38  ;;  %v447_v44 = vpop.permute.xlu1 %446 }
  0xde   :  { %638 = vtanh.f32 %v186_v43 }
  0xdf   :  { %640 = vtanh.f32 %v181_v45  ;;  %v575_v46 = vpop.f32.mrb[2].mxu0 }
  0xe0   :  { %v196_v47 = vadd.f32 %v575_v46, %v64_v41  ;;  %v190_v48 = vpop.f32.mrb[3].mxu0 }
  0xe1   :  { %v191_v50 = vadd.f32 %v190_v48, %v59_v39 }
  0xe2   :  { %642 = vtanh.f32 %v196_v47 }
  0xe3   :  { %644 = vtanh.f32 %v191_v50  ;;  %v578_v52 = vpop.f32.mrb[4].mxu0 }
  0xe4   :  { %v206_v53 = vadd.f32 %v578_v52, %v74_v49  ;;  %v200_v54 = vpop.f32.mrb[5].mxu0 }
  0xe5   :  { %v201_v55 = vadd.f32 %v200_v54, %v69_v51  ;;  %v452_v51 = vpop.permute.xlu0 %451 }
  0xe6   :  { %646 = vtanh.f32 %v206_v53 }
  0xe7   :  { %648 = vtanh.f32 %v201_v55  ;;  %v581_v57 = vpop.f32.mrb[6].mxu0 }
  0xe8   :  { %v639_v58 = vpop.eup %638  ;;  %v216_v60 = vadd.f32 %v581_v57, %v84_v56  ;;  %v210_v61 = vpop.f32.mrb[7].mxu0 }
  0xe9   :  { %v641_v62 = vpop.eup %640  ;;  %v211_v63 = vadd.f32 %v210_v61, %v79_v59  ;;  %v457_v57 = vpop.permute.xlu1 %456 }
  0xea   :  { %650 = vtanh.f32 %v216_v60  ;;  %v610_v0 = vpack.c.bf16 %v639_v58, %v641_v62 }
  0xeb   :  { %652 = vtanh.f32 %v211_v63 }
  0xec   :  { %v643_v1 = vpop.eup %642  ;;  %611 = vmatprep.subr.bf16.mxu0 %v610_v0  ;;  %626 = vmatprep.subr.bf16.mxu1 %v610_v0 }
  0xed   :  { %v645_v2 = vpop.eup %644  ;;  %613 = vmatpush3.bf16.msra.mxu0 %v610_v0  ;;  %630 = vmatpush3.bf16.msra.mxu1 %v610_v0 }
  0xee   :  { %v614_v3 = vpack.c.bf16 %v643_v1, %v645_v2  ;;  %v462_v2 = vpop.permute.xlu0 %461 }
  0xf0   :  { %v647_v4 = vpop.eup %646  ;;  %615 = vmatprep.subr.bf16.mxu0 %v614_v3  ;;  %627 = vmatprep.subr.bf16.mxu1 %v614_v3 }
  0xf1   :  { %v649_v5 = vpop.eup %648  ;;  %617 = vmatpush3.bf16.msra.mxu0 %v614_v3  ;;  %631 = vmatpush3.bf16.msra.mxu1 %v614_v3 }
  0xf2   :  { %v618_v6 = vpack.c.bf16 %v647_v4, %v649_v5 }
  0xf4   :  { %v651_v7 = vpop.eup %650  ;;  %619 = vmatprep.subr.bf16.mxu0 %v618_v6  ;;  %628 = vmatprep.subr.bf16.mxu1 %v618_v6 }
  0xf5   :  { %v653_v8 = vpop.eup %652  ;;  %621 = vmatpush3.bf16.msra.mxu0 %v618_v6  ;;  %632 = vmatpush3.bf16.msra.mxu1 %v618_v6  ;;  %v467_v6 = vpop.permute.xlu1 %466 }
  0xf6   :  { %v622_v9 = vpack.c.bf16 %v651_v7, %v653_v8 }
  0xf8   :  { %623 = vmatprep.subr.bf16.mxu0 %v622_v9  ;;  %629 = vmatprep.subr.bf16.mxu1 %v622_v9 }
  0xf9   :  { %625 = vmatpush3.bf16.msra.mxu0 %v622_v9  ;;  %633 = vmatpush3.bf16.msra.mxu1 %v622_v9 }
  0xfc   :  { %599 = vmatmul.mubr.msk.f32.vlgmr.msra.gmra.mrb[8].mxu0 %vm283_vm1, %v228_v10  ;;  %602 = vmatmul.mubr.msk.f32.vlgmr.msra.gmra.mrb[0].mxu1 %vm283_vm1, %v230_v11 }
  0xfd   :  { %604 = vmatprep.mubr.msk.f32.mxu1 %vm283_vm1, %v231_v12 }
 0x100   :  { %605 = vmatmul.mubr.msk.f32.gmra.mrb[2].mxu1 %vm283_vm1, %v232_v13 }
 0x101   :  { %607 = vmatprep.mubr.msk.f32.mxu1 %vm283_vm1, %v233_v14  ;;  %v505_v14 = vlaneseq }
 0x104   :  { %608 = vmatmul.mubr.msk.f32.gmra.mrb[4].mxu1 %vm283_vm1, %v234_v15 }
 0x1cf   :  { %v600_v24 = vpop.f32.mrb[8].mxu0  ;;  %v603_v25 = vpop.f32.mrb[0].mxu1 }
 0x1d0   :  { %v380_v26 = vadd.f32 %v600_v24, %v251_v17  ;;  %v390_v27 = vadd.f32 %v603_v25, %v261_v19  ;;  %v374_v28 = vpop.f32.mrb[9].mxu0  ;;  %v384_v29 = vpop.f32.mrb[1].mxu1  ;;  %v506_v17 = vshrl.u32 %v505_v14, 7 }
 0x1d1   :  { %v375_v30 = vadd.f32 %v374_v28, %v246_v16  ;;  %v385_v31 = vadd.f32 %v384_v29, %v256_v18 }
 0x1d2   :  { %654 = vtanh.f32 %v380_v26 }
 0x1d3   :  { %656 = vtanh.f32 %v390_v27  ;;  %v606_v32 = vpop.f32.mrb[2].mxu1 }
 0x1d4   :  { %658 = vtanh.f32 %v375_v30  ;;  %v400_v34 = vadd.f32 %v606_v32, %v271_v21  ;;  %v394_v35 = vpop.f32.mrb[3].mxu1 }
 0x1d5   :  { %660 = vtanh.f32 %v385_v31  ;;  %v395_v36 = vadd.f32 %v394_v35, %v266_v20  ;;  %v507_v20 = vsub.s32 0, %v506_v17 }
 0x1d7   :  { %662 = vtanh.f32 %v395_v36  ;;  %v609_v38 = vpop.f32.mrb[4].mxu1 }
 0x1d8   :  { %664 = vtanh.f32 %v400_v34  ;;  %v410_v39 = vadd.f32 %v609_v38, %v281_v23  ;;  %v404_v40 = vpop.f32.mrb[5].mxu1 }
 0x1d9   :  { %v405_v41 = vadd.f32 %v404_v40, %v276_v22  ;;  %v503_v22 = vpop.permute.xlu0 %502 }
 0x1da   :  { %v508_v24 = vrot.slane %v503_v22, %v507_v20 }
 0x1db   :  { %666 = vtanh.f32 %v405_v41 }
 0x1dc   :  { %v655_v43 = vpop.eup %654  ;;  %668 = vtanh.f32 %v410_v39 }
 0x1dd   :  { %v657_v45 = vpop.eup %656  ;;  %v470_v46 = vmul.f32 %v655_v43, %v437_v37 }
 0x1de   :  { %v659_v47 = vpop.eup %658  ;;  %v472_v54 = vmul.f32 %v657_v45, %v447_v44 }
 0x1df   :  { %v661_v48 = vpop.eup %660  ;;  %v479_v49 = vsel %vm477_vm2, %v470_v46, 0.0  ;;  %v469_v50 = vmul.f32 %v659_v47, %v432_v33 }
 0x1e0   :  { %v471_v52 = vmul.f32 %v661_v48, %v442_v42  ;;  %v483_v63 = vsel %vm477_vm2, %v472_v54, 0.0 }
 0x1e1   :  { %v663_v53 = vpop.eup %662  ;;  %v478_v55 = vsel %vm477_vm2, %v469_v50, 0.0 }
 0x1e2   :  { %v665_v56 = vpop.eup %664  ;;  %v480_v58 = vadd.f32 %v479_v49, %v478_v55  ;;  %v481_v59 = vsel %vm477_vm2, %v471_v52, 0.0  ;;  %v473_v60 = vmul.f32 %v663_v53, %v452_v51 }
 0x1e3   :  { %v474_v0 = vmul.f32 %v665_v56, %v457_v57 }
 0x1e4   :  { %v482_v61 = vadd.f32 %v481_v59, %v480_v58  ;;  %v485_v4 = vsel %vm477_vm2, %v473_v60, 0.0 }
 0x1e5   :  { %v667_v62 = vpop.eup %666  ;;  %v487_v8 = vsel %vm477_vm2, %v474_v0, 0.0 }
 0x1e6   :  { %v669_v1 = vpop.eup %668  ;;  %v484_v3 = vadd.f32 %v483_v63, %v482_v61  ;;  %v475_v5 = vmul.f32 %v667_v62, %v462_v2 }
 0x1e7   :  { %v476_v9 = vmul.f32 %v669_v1, %v467_v6 }
 0x1e8   :  { %v486_v7 = vadd.f32 %v485_v4, %v484_v3  ;;  %v489_v11 = vsel %vm477_vm2, %v475_v5, 0.0 }
 0x1e9   :  { %v491_v13 = vsel %vm477_vm2, %v476_v9, 0.0 }
 0x1ea   :  { %v488_v10 = vadd.f32 %v487_v8, %v486_v7 }
 0x1ec   :  { %v490_v12 = vadd.f32 %v489_v11, %v488_v10 }
 0x1ee   :  { %v492_v15 = vadd.f32 %v491_v13, %v490_v12 }
 0x1f0   :  { %v493_v16 = vrot.slane %v492_v15, 4 }
 0x1f2   :  { %v494_v18 = vadd.f32 %v493_v16, %v492_v15 }
 0x1f4   :  { %v495_v19 = vrot.slane %v494_v18, 2 }
 0x1f6   :  { %v496_v21 = vadd.f32 %v495_v19, %v494_v18 }
 0x1f8   :  { %v497_v23 = vrot.slane %v496_v21, 1 }
 0x1fa   :  { %v498_v25 = vadd.f32 %v497_v23, %v496_v21 }
 0x1fc   :  { %v509_v26 = vadd.f32 %v508_v24, %v498_v25 }
 0x1fe   :  { %511 = vst.msk [vmem:[#allocation3] sm:$0x1] %vm510_vm3, %v509_v26 }
 0x1ff   :  { %681 = shalt.err (!%p678_p4)
}
 0x200   :  { %s682_s4 = scalar_lea.hbm %s907_s7, 16 }
 0x201   :  { %p683_p5 = scmp.ne.s32.totalorder %s907_s7, %s682_s4  ;;  %p686_p6 = scmp.lt.u32.totalorder %s682_s4, %s907_s7 }
 0x203   :  { %p688_p7 = pnand %p686_p6, %p683_p5 }
 0x205   :  { %691 = shalt.err (!%p688_p7)
}
 0x206   :  { %521 = dma.vmem_to_hbm [thread:$0]  %s519_s27, 16, %s907_s7, [#allocation4]  }
 0x207   :  { %692 = dma.done.wait [#allocation4], 16  }
 0x208   :  { %693 = vsyncadd [#allocation4], 4294967280 }
 0x209   :  { %525 = vsyncpa [#allocation4], 1 }

</bundles_post_ra>
